<compile_context>
chip_gen: v5e
topology: v5e:2x2
jax: 0.10.0
libtpu: 0.0.40
codegen_flags: <defaults>
</compile_context>

<pallas_src>
import functools

import jax
import jax.numpy as jnp
import numpy as np
from jax.experimental import pallas as pl
from jax.experimental.pallas import tpu as pltpu


# --------------------------------------------------------------------------
# Helpers
# --------------------------------------------------------------------------
def _pick_block(n, preferred):
    """Largest divisor of n that is <= preferred and a multiple of 8 (else n)."""
    if n <= preferred:
        return n
    b = (preferred // 8) * 8
    while b >= 8:
        if n % b == 0:
            return b
        b -= 8
    return n


def _vmem_limit_bytes():
    """Per-generation VMEM budget (v7x: 64 MiB physical, v5e/v6e: 128 MiB)."""
    try:
        cap = pltpu.get_tpu_info().vmem_capacity_bytes
    except Exception:
        cap = 64 * 1024 * 1024
    return int(min(int(cap * 0.80), 110 * 1024 * 1024))


def _const_spec(block_shape, index_map):
    """BlockSpec for operands whose block index never changes across the grid.

    Single-buffer them (halves resident VMEM for the weight slabs) when the
    installed jax exposes pipeline_mode; otherwise fall back to a plain spec.
    """
    if hasattr(pl, "Buffered"):
        try:
            return pl.BlockSpec(block_shape, index_map,
                                pipeline_mode=pl.Buffered(1))
        except (TypeError, Exception):
            pass
    return pl.BlockSpec(block_shape, index_map)


# --------------------------------------------------------------------------
# Projection kernel:  y = x @ W^T + b, split column-wise into multiple outputs
# --------------------------------------------------------------------------
def _proj_kernel(x_ref, wT_ref, b_ref, *out_refs, mxu_dtype):
    y = jnp.dot(x_ref[...].astype(mxu_dtype), wT_ref[...],
                preferred_element_type=jnp.float32) + b_ref[...]
    off = 0
    for o_ref in out_refs:
        w = o_ref.shape[-1]
        o_ref[...] = y[:, off:off + w].astype(o_ref.dtype)
        off += w


def _project(x2d, wT, b, *, out_widths, out_dtypes, mxu_dtype, vmem_limit,
             block_rows=256):
    rows, h_in = x2d.shape
    rb = _pick_block(rows, block_rows)
    n_blocks = rows // rb
    kernel = functools.partial(_proj_kernel, mxu_dtype=mxu_dtype)
    out_shape = [jax.ShapeDtypeStruct((rows, w), dt)
                 for w, dt in zip(out_widths, out_dtypes)]
    out_specs = [pl.BlockSpec((rb, w), lambda i: (i, 0)) for w in out_widths]
    outs = pl.pallas_call(
        kernel,
        grid=(n_blocks,),
        in_specs=[
            pl.BlockSpec((rb, h_in), lambda i: (i, 0)),       # activations
            _const_spec((h_in, wT.shape[1]), lambda i: (0, 0)),  # fused weight
            _const_spec((1, b.shape[1]), lambda i: (0, 0)),       # fused bias
        ],
        out_specs=out_specs,
        out_shape=out_shape,
        compiler_params=pltpu.CompilerParams(
            dimension_semantics=("parallel",),
            vmem_limit_bytes=vmem_limit),
    )(x2d, wT, b)
    if not isinstance(outs, (list, tuple)):
        outs = (outs,)
    return tuple(outs)


# --------------------------------------------------------------------------
# Flash-attention kernel: grid = (B, S//Sb, T//Tb), online softmax over T
# --------------------------------------------------------------------------
def _flash_kernel(q_ref, k_ref, v_ref, am_ref, kim_ref, woT_ref, bo_ref,
                  out_ref, qh_sc, m_sc, l_sc, acc_sc,
                  *, num_heads, dim_head, mxu_dtype, approx_recip):
    N, dh = num_heads, dim_head
    H = N * dh
    Sb = q_ref.shape[1]
    Tb = k_ref.shape[1]
    ti = pl.program_id(2)

    @pl.when(ti == 0)
    def _init():
        # Head-split of the (projected, pre-scaled) query block is computed
        # once per query block and cached for every KV block.
        qh_sc[...] = (q_ref[0].reshape(Sb, N, dh)
                      .transpose(1, 0, 2).astype(mxu_dtype))
        m_sc[...] = jnp.full(m_sc.shape, -1e30, jnp.float32)
        l_sc[...] = jnp.zeros(l_sc.shape, jnp.float32)
        acc_sc[...] = jnp.zeros(acc_sc.shape, jnp.float32)

    # Combined additive mask bias for this (query-block, key-block) tile.
    masked = (am_ref[...] > 0) | (kim_ref[0] > 0)            # [Sb, Tb] bool
    bias = jnp.where(masked, -1e30, 0.0).astype(jnp.float32)  # [Sb, Tb]

    kh = k_ref[0].reshape(Tb, N, dh).transpose(1, 0, 2).astype(mxu_dtype)
    vh = v_ref[0].reshape(Tb, N, dh).transpose(1, 0, 2).astype(mxu_dtype)

    s = jnp.einsum('nsd,ntd->nst', qh_sc[...], kh,
                   preferred_element_type=jnp.float32)        # [N, Sb, Tb]
    s = s + bias[None]

    m_prev = m_sc[...]
    m_new = jnp.maximum(m_prev, jnp.max(s, axis=-1, keepdims=True))
    alpha = jnp.exp(m_prev - m_new)
    e = jnp.exp(s - m_new)                                    # [N, Sb, Tb]
    l_sc[...] = alpha * l_sc[...] + jnp.sum(e, axis=-1, keepdims=True)
    # Un-normalized PV matmul; normalization is deferred to the finalize step.
    acc_sc[...] = alpha * acc_sc[...] + jnp.einsum(
        'nst,ntd->nsd', e.astype(mxu_dtype), vh,
        preferred_element_type=jnp.float32)
    m_sc[...] = m_new

    @pl.when(ti == pl.num_programs(2) - 1)
    def _finalize():
        inv_l = pl.reciprocal(l_sc[...], approx=approx_recip)  # [N, Sb, 1]
        # Query rows with every key masked: PyTorch softmax -> NaN -> 0.
        fully_masked = m_sc[...] < -1e29
        ctx_h = jnp.where(fully_masked, 0.0, acc_sc[...] * inv_l)  # [N,Sb,dh]
        ctx = ctx_h.transpose(1, 0, 2).reshape(Sb, H)
        out = jnp.dot(ctx.astype(mxu_dtype), woT_ref[...],
                      preferred_element_type=jnp.float32) + bo_ref[...]
        out_ref[0] = out.astype(out_ref.dtype)


def _flash_attention(q_p, k_slab, v_slab, am_i8, kim_i8, woT, bo2,
                     *, num_heads, dim_head, mxu_dtype, approx_recip,
                     block_q, block_k, vmem_limit):
    B, S, H = q_p.shape
    T = k_slab.shape[1]
    Sb = _pick_block(S, block_q)
    Tb = _pick_block(T, block_k)
    N, dh = num_heads, dim_head

    kernel = functools.partial(
        _flash_kernel, num_heads=N, dim_head=dh,
        mxu_dtype=mxu_dtype, approx_recip=approx_recip)

    return pl.pallas_call(
        kernel,
        grid=(B, S // Sb, T // Tb),
        in_specs=[
            pl.BlockSpec((1, Sb, H), lambda b, si, ti: (b, si, 0)),   # q (scaled)
            pl.BlockSpec((1, Tb, H), lambda b, si, ti: (b, ti, 0)),   # k slab
            pl.BlockSpec((1, Tb, H), lambda b, si, ti: (b, ti, 0)),   # v slab
            pl.BlockSpec((Sb, Tb), lambda b, si, ti: (si, ti)),       # attn mask (int8)
            pl.BlockSpec((1, 1, Tb), lambda b, si, ti: (b, 0, ti)),   # key-ignore mask
            _const_spec((H, H), lambda b, si, ti: (0, 0)),            # Wo^T
            _const_spec((1, H), lambda b, si, ti: (0, 0)),            # bo
        ],
        out_specs=pl.BlockSpec((1, Sb, H), lambda b, si, ti: (b, si, 0)),
        out_shape=jax.ShapeDtypeStruct((B, S, H), jnp.float32),
        scratch_shapes=[
            pltpu.VMEM((N, Sb, dh), mxu_dtype),    # cached head-split q block
            pltpu.VMEM((N, Sb, 1), jnp.float32),   # running row max
            pltpu.VMEM((N, Sb, 1), jnp.float32),   # running softmax denom
            pltpu.VMEM((N, Sb, dh), jnp.float32),  # running PV numerator
        ],
        compiler_params=pltpu.CompilerParams(
            dimension_semantics=("parallel", "parallel", "arbitrary"),
            vmem_limit_bytes=vmem_limit),
    )(q_p, k_slab, v_slab, am_i8, kim_i8, woT, bo2)


# --------------------------------------------------------------------------
# Public wrapper
# --------------------------------------------------------------------------
def multihead_attention(query, key_value=None, params=None,
                        key_ignorance_mask=None, attention_mask=None,
                        prev_key_value=None, is_self=False,
                        *, num_heads, mxu_dtype=jnp.bfloat16,
                        block_q=256, block_k=256):
    """Host-side parameter transforms + projection kernel + flash kernel."""
    self_attention = key_value is None or key_value is query
    if key_value is None:
        key_value = query
    if prev_key_value is not None:
        # TODO(synk): incremental-decoding cache path not implemented.
        raise NotImplementedError("prev_key_value cache path is not kerneled")

    B = max(query.shape[0], key_value.shape[0])
    S, H = query.shape[1], query.shape[2]
    T = key_value.shape[1]
    if query.shape[0] != B:
        query = jnp.broadcast_to(query, (B, S, H))
    if key_value.shape[0] != B:
        key_value = jnp.broadcast_to(key_value, (B, T, H))

    dh = H // num_heads
    scale = 1.0 / (dh ** 0.5)
    f32 = jnp.float32
    vmem_limit = _vmem_limit_bytes()

    wq, bq, wk, bk, wv, bv, wo, bo = params
    woT = wo.T.astype(mxu_dtype)
    bo2 = bo.reshape(1, H).astype(f32)

    # Masks shipped as int8 (bias is built in-kernel).
    am_i8 = (jnp.zeros((S, T), jnp.int8) if attention_mask is None
             else attention_mask.astype(jnp.int8))
    kim_i8 = (jnp.zeros((B, 1, T), jnp.int8) if key_ignorance_mask is None
              else key_ignorance_mask.astype(jnp.int8).reshape(B, 1, T))

    if self_attention:
        # One fused [H, 3H] matmul; query rows DMA'd once.
        wqkvT = jnp.concatenate([wq.T * scale, wk.T, wv.T],
                                axis=1).astype(mxu_dtype)
        bqkv = jnp.concatenate([bq * scale, bk, bv]).reshape(1, 3 * H).astype(f32)
        q_p, k_slab, v_slab = _project(
            query.reshape(B * S, H), wqkvT, bqkv,
            out_widths=(H, H, H), out_dtypes=(f32, f32, f32),
            mxu_dtype=mxu_dtype, vmem_limit=vmem_limit)
    else:
        wqT = (wq.T * scale).astype(mxu_dtype)
        bq_s = (bq * scale).reshape(1, H).astype(f32)
        (q_p,) = _project(query.reshape(B * S, H), wqT, bq_s,
                          out_widths=(H,), out_dtypes=(f32,),
                          mxu_dtype=mxu_dtype, vmem_limit=vmem_limit)
        wkvT = jnp.concatenate([wk.T, wv.T], axis=1).astype(mxu_dtype)
        bkv = jnp.concatenate([bk, bv]).reshape(1, 2 * H).astype(f32)
        k_slab, v_slab = _project(key_value.reshape(B * T, H), wkvT, bkv,
                                  out_widths=(H, H), out_dtypes=(f32, f32),
                                  mxu_dtype=mxu_dtype, vmem_limit=vmem_limit)

    q_p = q_p.reshape(B, S, H)
    k_slab = k_slab.reshape(B, T, H)
    v_slab = v_slab.reshape(B, T, H)

    out = _flash_attention(
        q_p, k_slab, v_slab, am_i8, kim_i8, woT, bo2,
        num_heads=num_heads, dim_head=dh, mxu_dtype=mxu_dtype,
        approx_recip=(mxu_dtype != jnp.float32),
        block_q=block_q, block_k=block_k, vmem_limit=vmem_limit)

    # Caller-facing cache layout [B, N, T, dh] (matches the PyTorch module).
    # TODO(synk): consumers that accept the lane-dense [B, T, H] slab should
    # take v_slab directly and skip this relayout.
    new_value = v_slab.reshape(B, T, num_heads, dh).transpose(0, 2, 1, 3)
    return out, (k_slab, new_value)


# --------------------------------------------------------------------------
# Plain-JAX reference mirroring the PyTorch forward (with masks)
# --------------------------------------------------------------------------
def _reference(query, key_value, params, num_heads, kim=None, am=None):
    wq, bq, wk, bk, wv, bv, wo, bo = params
    B, S, H = query.shape
    T = key_value.shape[1]
    dh = H // num_heads
    q = (query @ wq.T + bq) / (dh ** 0.5)
    k = key_value @ wk.T + bk
    v = key_value @ wv.T + bv
    qh = q.reshape(B, S, num_heads, dh).transpose(0, 2, 1, 3)
    kh = k.reshape(B, T, num_heads, dh).transpose(0, 2, 1, 3)
    vh = v.reshape(B, T, num_heads, dh).transpose(0, 2, 1, 3)
    scores = jnp.einsum('bnsd,bntd->bnst', qh, kh)
    if am is not None:
        scores = jnp.where(am.astype(bool)[None, None], -jnp.inf, scores)
    if kim is not None:
        scores = jnp.where(kim.astype(bool)[:, None, None, :], -jnp.inf, scores)
    p = jax.nn.softmax(scores, axis=-1)
    p = jnp.where(jnp.isnan(p), 0.0, p)
    ctx = jnp.einsum('bnst,bntd->bnsd', p, vh)
    ctx = ctx.transpose(0, 2, 1, 3).reshape(B, S, H)
    return ctx @ wo.T + bo, k, vh


# --------------------------------------------------------------------------
# Self-test
# --------------------------------------------------------------------------
if __name__ == "__main__":
    B, S, T = 2, 8, 16
    H, N = 32, 4  # hidden_dim=32, num_heads=4 -> dim_head=8

    key = jax.random.PRNGKey(0)
    ks = jax.random.split(key, 10)
    init = lambda k, shape, scale=0.1: jax.random.normal(k, shape, jnp.float32) * scale

    params = (
        init(ks[0], (H, H)), init(ks[1], (H,)),   # linear_q
        init(ks[2], (H, H)), init(ks[3], (H,)),   # linear_k
        init(ks[4], (H, H)), init(ks[5], (H,)),   # linear_v
        init(ks[6], (H, H)), init(ks[7], (H,)),   # linear_out
    )
    query = jax.random.normal(ks[8], (B, S, H), jnp.float32)
    key_value = jax.random.normal(ks[9], (B, T, H), jnp.float32)

    # --- Test 1: cross-attention, unmasked, f32 MXU (exact-semantics check) ---
    out, (nk, nv) = multihead_attention(query, key_value, params,
                                        num_heads=N, mxu_dtype=jnp.float32)
    jax.block_until_ready((out, nk, nv))
    r_out, r_k, r_v = _reference(query, key_value, params, N)
    np.testing.assert_allclose(np.asarray(out), np.asarray(r_out), rtol=1e-4, atol=1e-4)
    np.testing.assert_allclose(np.asarray(nk), np.asarray(r_k), rtol=1e-4, atol=1e-4)
    np.testing.assert_allclose(np.asarray(nv), np.asarray(r_v), rtol=1e-4, atol=1e-4)

    # --- Test 2: masked (incl. a fully-masked query row), f32 MXU ---
    am_bool = np.zeros((S, T), dtype=bool)
    am_bool[0, :] = True            # query row 0: every key masked -> output = bias
    am_bool[3, 9:] = True           # partial masking
    kim_bool = np.zeros((B, T), dtype=bool)
    kim_bool[1, -2:] = True         # batch 1 ignores last two keys
    am_j, kim_j = jnp.asarray(am_bool), jnp.asarray(kim_bool)

    out_m, (nk_m, nv_m) = multihead_attention(
        query, key_value, params, key_ignorance_mask=kim_j, attention_mask=am_j,
        num_heads=N, mxu_dtype=jnp.float32)
    jax.block_until_ready((out_m, nk_m, nv_m))
    r_out_m, r_k_m, r_v_m = _reference(query, key_value, params, N, kim=kim_j, am=am_j)
    np.testing.assert_allclose(np.asarray(out_m), np.asarray(r_out_m), rtol=1e-4, atol=1e-4)
    np.testing.assert_allclose(np.asarray(nk_m), np.asarray(r_k_m), rtol=1e-4, atol=1e-4)
    np.testing.assert_allclose(np.asarray(nv_m), np.asarray(r_v_m), rtol=1e-4, atol=1e-4)

    # --- Test 3: self-attention fast path (fused QKV), f32 MXU ---
    out_s, (nk_s, nv_s) = multihead_attention(query, None, params,
                                              num_heads=N, mxu_dtype=jnp.float32)
    jax.block_until_ready((out_s, nk_s, nv_s))
    r_out_s, r_k_s, r_v_s = _reference(query, query, params, N)
    np.testing.assert_allclose(np.asarray(out_s), np.asarray(r_out_s), rtol=1e-4, atol=1e-4)
    np.testing.assert_allclose(np.asarray(nk_s), np.asarray(r_k_s), rtol=1e-4, atol=1e-4)
    np.testing.assert_allclose(np.asarray(nv_s), np.asarray(r_v_s), rtol=1e-4, atol=1e-4)

    # --- Test 4: default bf16 MXU path (f32 accumulation), looser tolerance ---
    out_b, (nk_b, nv_b) = multihead_attention(
        query, key_value, params, key_ignorance_mask=kim_j, attention_mask=am_j,
        num_heads=N)  # mxu_dtype=bf16 default
    jax.block_until_ready((out_b, nk_b, nv_b))
    np.testing.assert_allclose(np.asarray(out_b), np.asarray(r_out_m), rtol=4e-2, atol=4e-2)
    np.testing.assert_allclose(np.asarray(nk_b), np.asarray(r_k_m), rtol=4e-2, atol=4e-2)
    np.testing.assert_allclose(np.asarray(nv_b), np.asarray(r_v_m), rtol=4e-2, atol=4e-2)

    print("KERNEL_OK")
</pallas_src>

<mosaic_0001>
module attributes {stable_mosaic.version = 11 : i64} {
  func.func @_proj_kernel(%arg0: i32, %arg1: memref<16x32xf32, #tpu.memory_space<vmem>>, %arg2: memref<32x32xf32, #tpu.memory_space<vmem>>, %arg3: memref<1x32xf32, #tpu.memory_space<vmem>>, %arg4: memref<16x32xf32, #tpu.memory_space<vmem>>) attributes {dimension_semantics = [#tpu.dimension_semantics<parallel>], iteration_bounds = array<i64: 1>, scalar_prefetch = 0 : i64, scratch_operands = 0 : i64, tpu.core_type = #tpu.core_type<tc>, window_params = [{transform_indices = @transform_0, window_bounds = array<i64: 16, 32>}, {pipeline_mode = #tpu.pipeline_mode<synchronous>, transform_indices = @transform_1, window_bounds = array<i64: 32, 32>}, {pipeline_mode = #tpu.pipeline_mode<synchronous>, transform_indices = @transform_2, window_bounds = array<i64: 1, 32>}, {transform_indices = @transform_3, window_bounds = array<i64: 16, 32>}]} {
    %c0 = arith.constant 0 : index
    %c0_0 = arith.constant 0 : index
    %0 = vector.load %arg1[%c0, %c0_0] : memref<16x32xf32, #tpu.memory_space<vmem>>, vector<16x32xf32>
    %c0_1 = arith.constant 0 : index
    %c0_2 = arith.constant 0 : index
    %1 = vector.load %arg2[%c0_1, %c0_2] : memref<32x32xf32, #tpu.memory_space<vmem>>, vector<32x32xf32>
    %cst = arith.constant dense<0.000000e+00> : vector<16x32xf32>
    %2 = tpu.matmul %0, %1, %cst {dimension_numbers = #tpu.dot_dimension_numbers<[1], [0], [0], [1], [0, 0, 1, 1], [], []>} : vector<16x32xf32>, vector<32x32xf32>, vector<16x32xf32> -> vector<16x32xf32>
    %c0_3 = arith.constant 0 : index
    %c0_4 = arith.constant 0 : index
    %3 = vector.load %arg3[%c0_3, %c0_4] : memref<1x32xf32, #tpu.memory_space<vmem>>, vector<1x32xf32>
    %4 = vector.broadcast %3 : vector<1x32xf32> to vector<16x32xf32>
    %5 = arith.addf %2, %4 : vector<16x32xf32>
    %c0_5 = arith.constant 0 : index
    %c0_6 = arith.constant 0 : index
    %6 = vector.load %arg4[%c0_5, %c0_6] : memref<16x32xf32, #tpu.memory_space<vmem>>, vector<16x32xf32>
    tpu.vector_store %arg4[%c0_5, %c0_6], %5 {strides = array<i32>} : memref<16x32xf32, #tpu.memory_space<vmem>>, vector<16x32xf32>,
    return
  }
  func.func @transform_0(%arg0: i32) -> (i32, i32) {
    %c0_i32 = arith.constant 0 : i32
    %c0_i32_0 = arith.constant 0 : i32
    return %arg0, %c0_i32 : i32, i32
  }
  func.func @transform_1(%arg0: i32) -> (i32, i32) {
    %c0_i32 = arith.constant 0 : i32
    %c0_i32_0 = arith.constant 0 : i32
    %c0_i32_1 = arith.constant 0 : i32
    return %c0_i32, %c0_i32_0 : i32, i32
  }
  func.func @transform_2(%arg0: i32) -> (i32, i32) {
    %c0_i32 = arith.constant 0 : i32
    %c0_i32_0 = arith.constant 0 : i32
    %c0_i32_1 = arith.constant 0 : i32
    return %c0_i32, %c0_i32_0 : i32, i32
  }
  func.func @transform_3(%arg0: i32) -> (i32, i32) {
    %c0_i32 = arith.constant 0 : i32
    %c0_i32_0 = arith.constant 0 : i32
    return %arg0, %c0_i32 : i32, i32
  }
}

</mosaic_0001>

<bundles_post_ra>
// kernel: tpu_custom_call.1
= control target key start
LH: loop header
LB: loop body
LE: loop exit
PB: predicated region body
PF: predicated region fallthrough
CT: control target
= control target key end

     0   :  { %8 = vsyncpa [#allocation3], 0  ;;  %s249_s0 = inlined_call_operand.hbm [shape: f32[16,32], index: 0, kind: input, shape index: {}]   ;;  %s250_s1 = inlined_call_operand.hbm [shape: f32[32,32], index: 1, kind: input, shape index: {}]   ;;  %s251_s2 = inlined_call_operand.vmem [shape: f32[1,32], index: 2, kind: input, shape index: {}]   ;;  %s252_s3 = inlined_call_operand.hbm [shape: f32[16,32], index: 3, kind: output, shape index: {}]  }
   0x1   :  { %9 = vsyncpa [#allocation6], 0 }
   0x2   :  { %10 = vsyncpa [#allocation4], 0  ;;  %s15_s14 = sshll.u32 %s249_s0, 4  ;;  %s199_s15 = smov [#allocation2]   ;;  %s16_s14 = int_to_ptr.hbm [resolvable:$true] %s15_s14 }
   0x3   :  { %s17_s16 = sshll.u32 %s199_s15, 4  ;;  %s28_s19 = sshll.u32 %s250_s1, 4  ;;  %s18_s16 = int_to_ptr.vmem [resolvable:$true] %s17_s16  ;;  %s29_s19 = int_to_ptr.hbm [resolvable:$true] %s28_s19 }
   0x4   :  { %s200_s20 = smov 128   ;;  %s201_s21 = smov 8  }
   0x5   :  { %23 = dma.hbm_to_vmem [thread:$0]  %s16_s14, 256, %s18_s16, [#allocation3], %s200_s20, %s200_s20, %s201_s21  }
   0x6   :  { %s202_s22 = smov [#allocation5]  }
   0x7   :  { %s30_s23 = sshll.u32 %s202_s22, 4  ;;  %s31_s23 = int_to_ptr.vmem [resolvable:$true] %s30_s23 }
   0x8   :  { %36 = dma.hbm_to_vmem [thread:$0]  %s29_s19, 512, %s31_s23, [#allocation6], %s200_s20, %s200_s20, %s201_s21  }
   0x9   :  { %193 = dma.done.wait [#allocation3], 256  }
   0xa   :  { %194 = vsyncadd [#allocation3], 4294967040 }
   0xb   :  { %195 = dma.done.wait [#allocation6], 512  }
   0xc   :  { %196 = vsyncadd [#allocation6], 4294966784  ;;  %v52_v0 = vld [vmem:[#allocation5 + $0x18] sm:$0xff]  ;;  %v51_v1 = vld [vmem:[#allocation5 + $0x10] sm:$0xff]  ;;  %vm57_vm0 = vcmask 261120   ;;  %s203_s24 = smov [#allocation7]  }
   0xd   :  { %76 = vmatpush.msra.mxu0 %v52_v0  ;;  %111 = vmatpush.msra.mxu1 %v52_v0  ;;  %v50_v2 = vld [vmem:[#allocation5 + $0x8] sm:$0xff]  ;;  %v49_v3 = vld [vmem:[#allocation5] sm:$0xff]  ;;  %v47_v4 = vld [vmem:[#allocation2] sm:$0xff]  ;;  %s93_s25 = sshll.u32 %s203_s24, 4  ;;  %s95_s28 = sshll.u32 %s252_s3, 4  ;;  %s94_s25 = int_to_ptr.vmem [resolvable:$true] %s93_s25  ;;  %s96_s28 = int_to_ptr.hbm [resolvable:$true] %s95_s28 }
   0xe   :  { %v48_v5 = vld [vmem:[#allocation2 + $0x8] sm:$0xff]  ;;  %v120_v6 = vld [vmem:[%s251_s2] ss:$0 sm:$0xff] }
   0xf   :  { %77 = vmatpush.msra.mxu0 %v51_v1  ;;  %112 = vmatpush.msra.mxu1 %v51_v1 }
  0x11   :  { %78 = vmatpush.msra.mxu0 %v50_v2  ;;  %113 = vmatpush.msra.mxu1 %v50_v2 }
  0x13   :  { %79 = vmatpush.msra.mxu0 %v49_v3  ;;  %114 = vmatpush.msra.mxu1 %v49_v3 }
  0x14   :  { %109 = vmatmul.msk.f32.vlgmr.msra.gmra.mxu0 %vm57_vm0, %v47_v4  ;;  %110 = vmatmul.msk.f32.vlgmr.msra.gmra.mxu1 %vm57_vm0, %v48_v5 }
  0x91   :  { %v81_v7 = vpop.f32.mrf.mxu0  ;;  %v84_v8 = vpop.f32.mrf.mxu1 }
  0x92   :  { %v82_v9 = vadd.f32 %v120_v6, %v81_v7  ;;  %v85_v10 = vadd.f32 %v120_v6, %v84_v8 }
  0x94   :  { %87 = vst.msk [vmem:[#allocation7] sm:$0xff] %vm57_vm0, %v82_v9 }
  0x95   :  { %88 = vst.msk [vmem:[#allocation7 + $0x8] sm:$0xff] %vm57_vm0, %v85_v10 }
  0x96   :  { %101 = dma.vmem_to_hbm [thread:$0]  %s94_s25, 256, %s96_s28, [#allocation4], %s200_s20, %s200_s20, %s201_s21  }
  0x97   :  { %197 = dma.done.wait [#allocation4], 256  }
  0x98   :  { %198 = vsyncadd [#allocation4], 4294967040 }
  0x99   :  { %106 = vsyncpa [#allocation3], 1 }
  0x9a   :  { %107 = vsyncpa [#allocation6], 1 }
  0x9b   :  { %108 = vsyncpa [#allocation4], 1 }

</bundles_post_ra>
